<compile_context>
chip_gen: v6e
topology: v6e:2x2x1
jax: 0.10.0
libtpu: 0.0.40
codegen_flags: <defaults>
</compile_context>

<pallas_src>
import jax
import jax.numpy as jnp
from jax import lax
from jax.experimental import pallas as pl
from jax.experimental.pallas import tpu as pltpu


def _round_up(x: int, m: int) -> int:
    return ((x + m - 1) // m) * m


def _round_down(x: int, m: int) -> int:
    return (x // m) * m


def _num_tensorcores() -> int:
    """Best-effort TensorCore count per chip (1 on v5e/v6e, 2 on v7x)."""
    try:
        info = pltpu.get_tpu_info()
        for attr in ("num_cores", "core_count", "num_tensorcores",
                     "tensorcore_count", "num_cores_per_chip"):
            v = getattr(info, attr, None)
            if v is None:
                continue
            try:
                v = int(v)
            except Exception:
                continue
            if 0 < v <= 8:
                return min(v, 2)
    except Exception:
        pass
    return 1   # safe fallback: never serialize extra passes on 1-TC chips


def _input_vmem_budget() -> int:
    """Bytes of VMEM to spend on (double-buffered) input blocks."""
    cap = 0
    try:
        cap = int(pltpu.get_tpu_info().vmem_capacity_bytes)
    except Exception:
        cap = 0
    if cap <= 0:
        cap = 64 << 20                       # conservative (v7x per-core size)
    return max(8 << 20, min(cap // 6, 20 << 20))


# -----------------------------------------------------------------------------
# Packed path: H*W % 128 == 0 -> tile over (rows_of_128_lanes) so every block
# uses all 8 sublanes regardless of batch size N.
# -----------------------------------------------------------------------------
def _make_packed_kernel(*, nrb, lr, r, acc_r, bps, total, mask_tail, mask_over):
    chunks = r // acc_r
    needs_mask = mask_tail or mask_over

    def _accumulate(t_ref, p_ref, acc_int, acc_den, row_limit=None):
        for k in range(chunks):
            sl = pl.ds(k * acc_r, acc_r)
            t = t_ref[sl, :].astype(jnp.float32)
            p = p_ref[sl, :].astype(jnp.float32)
            if row_limit is not None:
                rows = k * acc_r + lax.broadcasted_iota(jnp.int32, (acc_r, 128), 0)
                valid = rows < row_limit
                # NOTE: keep these as selects; multiply-by-mask could leak
                # NaN/Inf from the undefined pad region.
                t = jnp.where(valid, t, 0.0)
                p = jnp.where(valid, p, 0.0)
            acc_int[...] += p * t
            acc_den[...] += p + t

    def kernel(t_ref, p_ref, int_out_ref, den_out_ref, acc_int, acc_den):
        s = pl.program_id(0)          # parallel split (one per TensorCore)
        j = pl.program_id(1)          # sequential block index within the split

        @pl.when(j == 0)
        def _init():
            acc_int[...] = jnp.zeros_like(acc_int)
            acc_den[...] = jnp.zeros_like(acc_den)

        if needs_mask:
            g = s * bps + j           # intended (un-clamped) global block id
            rb = g % nrb              # intended row-block within its sample
            edge = None
            if mask_over:
                edge = g >= total
            if mask_tail:
                tail = rb == (nrb - 1)
                edge = tail if edge is None else jnp.logical_or(edge, tail)

            @pl.when(jnp.logical_not(edge))
            def _interior():
                _accumulate(t_ref, p_ref, acc_int, acc_den)

            @pl.when(edge)
            def _edge():
                row_limit = lr - rb * r
                if mask_over:
                    row_limit = jnp.where(g < total, row_limit, 0)
                _accumulate(t_ref, p_ref, acc_int, acc_den, row_limit=row_limit)
        else:
            _accumulate(t_ref, p_ref, acc_int, acc_den)

        @pl.when(j == pl.num_programs(1) - 1)
        def _finalize():
            ones = jnp.ones(int_out_ref.shape, jnp.float32)
            int_out_ref[...] = jnp.sum(acc_int[...]) * ones
            den_out_ref[...] = jnp.sum(acc_den[...]) * ones

    return kernel


# -----------------------------------------------------------------------------
# Generic fallback path: (N, l) / (N, C*l) views, lane-tiled.
# -----------------------------------------------------------------------------
def _make_flat_kernel(*, l, tile, acc_w, bps, mask_any):
    chunks = tile // acc_w
    first_masked = l // tile          # blocks >= this contain columns >= l

    def _accumulate(t_ref, p_ref, acc_int, acc_den, col0=None):
        for k in range(chunks):
            sl = pl.ds(k * acc_w, acc_w)
            t = t_ref[:, sl].astype(jnp.float32)
            p = p_ref[:, sl].astype(jnp.float32)
            if col0 is not None:
                col = col0 + k * acc_w + lax.broadcasted_iota(jnp.int32, t.shape, 1)
                valid = col < l
                t = jnp.where(valid, t, 0.0)
                p = jnp.where(valid, p, 0.0)
            acc_int[...] += p * t
            acc_den[...] += p + t

    def kernel(t_ref, p_ref, int_out_ref, den_out_ref, acc_int, acc_den):
        s = pl.program_id(0)
        j = pl.program_id(1)

        @pl.when(j == 0)
        def _init():
            acc_int[...] = jnp.zeros_like(acc_int)
            acc_den[...] = jnp.zeros_like(acc_den)

        if mask_any:
            g = s * bps + j           # intended (un-clamped) column-block id
            edge = g >= first_masked

            @pl.when(jnp.logical_not(edge))
            def _interior():
                _accumulate(t_ref, p_ref, acc_int, acc_den)

            @pl.when(edge)
            def _edge():
                _accumulate(t_ref, p_ref, acc_int, acc_den, col0=g * tile)
        else:
            _accumulate(t_ref, p_ref, acc_int, acc_den)

        @pl.when(j == pl.num_programs(1) - 1)
        def _finalize():
            ones = jnp.ones(int_out_ref.shape, jnp.float32)
            int_out_ref[...] = jnp.sum(acc_int[...]) * ones
            den_out_ref[...] = jnp.sum(acc_den[...]) * ones

    return kernel


def dice_loss(targets, pred, eps=1.0, *, tile=None, num_splits=None,
              vmem_limit_bytes=None, input_vmem_budget=None):
    """DiceLoss.forward(targets, pred, eps).

    targets: (N, H, W), pred: (N, C, H, W).  Returns a float32 scalar.
    `tile` (lane tile, forces the generic path) and `num_splits` are optional
    tuning knobs; defaults are chosen per TPU generation.
    """
    n, c, h, w = pred.shape
    assert targets.shape == (n, h, w), (targets.shape, pred.shape)
    l = h * w
    lr = l // 128

    if input_vmem_budget is None:
        input_vmem_budget = _input_vmem_budget()
    if num_splits is None:
        num_splits = _num_tensorcores()
    num_splits = max(1, int(num_splits))

    t_item = targets.dtype.itemsize
    p_item = pred.dtype.itemsize

    use_packed = (l % 128 == 0) and (lr >= 8) and (tile is None)

    if use_packed:
        # Free (layout-preserving) reshapes; channel 0 selected via index_map.
        pred_v = pred.reshape(n, c, lr, 128)
        targ_v = targets.reshape(n, lr, 128)

        per_row = 2 * 128 * (t_item + p_item)     # 2 pipeline buffers / input
        r = input_vmem_budget // per_row
        r = max(8, min(int(r), 2048, _round_down(lr, 8)))
        r = _round_down(r, 8)
        if r >= 64:
            r = _round_down(r, 64)
            acc_r = 64                            # 8 vregs per accumulator
        else:
            acc_r = r

        nrb = pl.cdiv(lr, r)                      # row blocks per sample
        total = n * nrb                           # total real blocks
        num_splits = max(1, min(num_splits, total))
        bps = pl.cdiv(total, num_splits)
        mask_tail = (lr % r) != 0
        mask_over = (num_splits * bps) != total

        def t_index(s, j):
            g = jnp.minimum(s * bps + j, total - 1)   # clamp: DMA stays in bounds
            return (g // nrb, g % nrb, 0)

        def p_index(s, j):
            g = jnp.minimum(s * bps + j, total - 1)
            return (g // nrb, 0, g % nrb, 0)          # channel 0 only

        in_specs = [
            pl.BlockSpec((None, r, 128), t_index),
            pl.BlockSpec((None, None, r, 128), p_index),
        ]
        inputs = (targ_v, pred_v)
        kernel = _make_packed_kernel(nrb=nrb, lr=lr, r=r, acc_r=acc_r, bps=bps,
                                     total=total, mask_tail=mask_tail,
                                     mask_over=mask_over)
        acc_shape = (acc_r, 128)
        block_in_bytes = 2 * r * 128 * (t_item + p_item)
    else:
        pred_v = pred.reshape(n, c * l)           # channel 0 = columns [0, l)
        targ_v = targets.reshape(n, l)
        rows_pad = _round_up(n, 8)

        if tile is None:
            per_lane = 2 * rows_pad * (t_item + p_item)
            tile = input_vmem_budget // per_lane
        tile = max(128, min(int(tile), 32768, _round_up(l, 128)))
        tile = _round_down(tile, 128)
        if tile > 512:
            tile = _round_down(tile, 512)
            acc_w = 512
        else:
            acc_w = tile

        n_blocks = pl.cdiv(l, tile)
        num_splits = max(1, min(num_splits, n_blocks))
        bps = pl.cdiv(n_blocks, num_splits)
        mask_any = not ((l % tile == 0) and (num_splits * bps == n_blocks))

        def in_index(s, j):
            return (0, jnp.minimum(s * bps + j, n_blocks - 1))

        in_specs = [
            pl.BlockSpec((n, tile), in_index),    # targets: (n, l)
            pl.BlockSpec((n, tile), in_index),    # pred:    (n, c*l), cols [0, l)
        ]
        inputs = (targ_v, pred_v)
        kernel = _make_flat_kernel(l=l, tile=tile, acc_w=acc_w, bps=bps,
                                   mask_any=mask_any)
        acc_shape = (n, acc_w)
        block_in_bytes = 2 * rows_pad * tile * (t_item + p_item)

    out_shape = jax.ShapeDtypeStruct((num_splits, 8, 128), jnp.float32)
    out_spec = pl.BlockSpec((1, 8, 128), lambda s, j: (s, 0, 0))

    if vmem_limit_bytes is None:
        acc_bytes = 2 * _round_up(acc_shape[0], 8) * acc_shape[1] * 4
        out_bytes = 2 * 2 * (8 * 128 * 4)
        footprint = block_in_bytes + acc_bytes + out_bytes
        # Explicit limit from the computed footprint (+ headroom), capped at the
        # 32 MiB scoped default which is safe on v5e/v6e/v7x.
        vmem_limit_bytes = int(min(max(footprint * 3 // 2 + (4 << 20), 16 << 20),
                                   32 << 20))

    out_int, out_den = pl.pallas_call(
        kernel,
        out_shape=(out_shape, out_shape),
        grid_spec=pltpu.PrefetchScalarGridSpec(
            num_scalar_prefetch=0,
            grid=(num_splits, bps),
            in_specs=in_specs,
            out_specs=(out_spec, out_spec),
            scratch_shapes=[
                pltpu.VMEM(acc_shape, jnp.float32),   # sum(pred * targets)
                pltpu.VMEM(acc_shape, jnp.float32),   # sum(pred) + sum(targets)
            ],
        ),
        compiler_params=pltpu.CompilerParams(
            dimension_semantics=("parallel", "arbitrary"),
            vmem_limit_bytes=vmem_limit_bytes,
        ),
    )(*inputs)

    inter = jnp.sum(out_int[:, 0, 0])
    den = jnp.sum(out_den[:, 0, 0])
    eps = jnp.float32(eps)
    return (1.0 - (2.0 * inter + eps) / (den + eps)).astype(jnp.float32)


if __name__ == "__main__":
    key = jax.random.PRNGKey(0)
    keys = jax.random.split(key, 10)

    def reference(targets, pred, eps=1.0):
        p = pred[:, 0].astype(jnp.float32).reshape(pred.shape[0], -1)
        t = targets.astype(jnp.float32).reshape(targets.shape[0], -1)
        return 1.0 - (2.0 * jnp.sum(p * t) + eps) / (jnp.sum(p) + jnp.sum(t) + eps)

    def check(name, targets, pred, **kw):
        got = jax.block_until_ready(dice_loss(targets, pred, eps=1.0, **kw))
        want = reference(targets, pred, eps=1.0)
        assert jnp.allclose(got, want, rtol=1e-4, atol=1e-5), (name, got, want)

    # 1) Canonical small shape: flat path, single block, no masking.
    pred = jax.nn.sigmoid(jax.random.normal(keys[0], (2, 4, 16, 16), jnp.float32))
    targ = (jax.random.uniform(keys[1], (2, 16, 16)) > 0.5).astype(jnp.float32)
    check("flat/basic", targ, pred)

    # 2) Flat path: 3 column blocks over a forced 2-way split (clamped,
    #    fully-masked overshoot step) with explicit tile=128.
    pred = jax.nn.sigmoid(jax.random.normal(keys[2], (3, 2, 12, 32), jnp.float32))
    targ = (jax.random.uniform(keys[3], (3, 12, 32)) > 0.5).astype(jnp.float32)
    check("flat/split+overshoot", targ, pred, tile=128, num_splits=2)

    # 3) Packed path (H*W % 128 == 0), bf16 predictions, default splits.
    pred = jax.nn.sigmoid(jax.random.normal(keys[4], (2, 3, 32, 32),
                                            jnp.float32)).astype(jnp.bfloat16)
    targ = (jax.random.uniform(keys[5], (2, 32, 32)) > 0.5).astype(jnp.float32)
    check("packed/bf16", targ, pred)

    # 4) Packed path with a ragged sublane tail and an exact 2-way split.
    pred = jax.nn.sigmoid(jax.random.normal(keys[6], (1, 2, 20, 64), jnp.float32))
    targ = (jax.random.uniform(keys[7], (1, 20, 64)) > 0.5).astype(jnp.float32)
    check("packed/tail+split", targ, pred, num_splits=2)

    # 5) Packed path, C == 1, non-dividing split (one masked overshoot step).
    pred = jax.nn.sigmoid(jax.random.normal(keys[8], (3, 1, 32, 32), jnp.float32))
    targ = (jax.random.uniform(keys[9], (3, 32, 32)) > 0.5).astype(jnp.float32)
    check("packed/overshoot", targ, pred, num_splits=2)

    print("KERNEL_OK")
</pallas_src>

<mosaic_0001>
module attributes {stable_mosaic.version = 11 : i64} {
  func.func @kernel(%arg0: i32, %arg1: i32, %arg2: memref<2x256xf32, #tpu.memory_space<vmem>>, %arg3: memref<2x256xf32, #tpu.memory_space<vmem>>, %arg4: memref<1x8x128xf32, #tpu.memory_space<vmem>>, %arg5: memref<1x8x128xf32, #tpu.memory_space<vmem>>, %arg6: memref<2x256xf32, #tpu.memory_space<vmem>>, %arg7: memref<2x256xf32, #tpu.memory_space<vmem>>) attributes {dimension_semantics = [#tpu.dimension_semantics<parallel>, #tpu.dimension_semantics<arbitrary>], iteration_bounds = array<i64: 1, 1>, scalar_prefetch = 0 : i64, scratch_operands = 2 : i64, tpu.core_type = #tpu.core_type<tc>, window_params = [{transform_indices = @transform_0, window_bounds = array<i64: 2, 256>}, {transform_indices = @transform_1, window_bounds = array<i64: 2, 256>}, {transform_indices = @transform_2, window_bounds = array<i64: 1, 8, 128>}, {transform_indices = @transform_3, window_bounds = array<i64: 1, 8, 128>}]} {
    %c0_i32 = arith.constant 0 : i32
    %0 = arith.cmpi eq, %arg1, %c0_i32 : i32
    %1 = arith.extui %0 : i1 to i32
    %c0_i32_0 = arith.constant 0 : i32
    %2 = arith.cmpi ne, %1, %c0_i32_0 : i32
    scf.if %2 {
      %cst = arith.constant 0.000000e+00 : f32
      %16 = vector.broadcast %cst : f32 to vector<2x256xf32>
      %c0_14 = arith.constant 0 : index
      %c0_15 = arith.constant 0 : index
      %17 = vector.load %arg6[%c0_14, %c0_15] : memref<2x256xf32, #tpu.memory_space<vmem>>, vector<2x256xf32>
      tpu.vector_store %arg6[%c0_14, %c0_15], %16 {strides = array<i32>} : memref<2x256xf32, #tpu.memory_space<vmem>>, vector<2x256xf32>,
      %cst_16 = arith.constant 0.000000e+00 : f32
      %18 = vector.broadcast %cst_16 : f32 to vector<2x256xf32>
      %c0_17 = arith.constant 0 : index
      %c0_18 = arith.constant 0 : index
      %19 = vector.load %arg7[%c0_17, %c0_18] : memref<2x256xf32, #tpu.memory_space<vmem>>, vector<2x256xf32>
      tpu.vector_store %arg7[%c0_17, %c0_18], %18 {strides = array<i32>} : memref<2x256xf32, #tpu.memory_space<vmem>>, vector<2x256xf32>,
    } else {
    }
    %c0 = arith.constant 0 : index
    %c0_1 = arith.constant 0 : index
    %3 = vector.load %arg2[%c0, %c0_1] : memref<2x256xf32, #tpu.memory_space<vmem>>, vector<2x256xf32>
    %c0_2 = arith.constant 0 : index
    %c0_3 = arith.constant 0 : index
    %4 = vector.load %arg3[%c0_2, %c0_3] : memref<2x256xf32, #tpu.memory_space<vmem>>, vector<2x256xf32>
    %c0_4 = arith.constant 0 : index
    %c0_5 = arith.constant 0 : index
    %5 = vector.load %arg6[%c0_4, %c0_5] : memref<2x256xf32, #tpu.memory_space<vmem>>, vector<2x256xf32>
    %6 = arith.mulf %4, %3 : vector<2x256xf32>
    %7 = arith.addf %5, %6 : vector<2x256xf32>
    %c0_6 = arith.constant 0 : index
    %c0_7 = arith.constant 0 : index
    %8 = vector.load %arg6[%c0_6, %c0_7] : memref<2x256xf32, #tpu.memory_space<vmem>>, vector<2x256xf32>
    tpu.vector_store %arg6[%c0_6, %c0_7], %7 {strides = array<i32>} : memref<2x256xf32, #tpu.memory_space<vmem>>, vector<2x256xf32>,
    %c0_8 = arith.constant 0 : index
    %c0_9 = arith.constant 0 : index
    %9 = vector.load %arg7[%c0_8, %c0_9] : memref<2x256xf32, #tpu.memory_space<vmem>>, vector<2x256xf32>
    %10 = arith.addf %4, %3 : vector<2x256xf32>
    %11 = arith.addf %9, %10 : vector<2x256xf32>
    %c0_10 = arith.constant 0 : index
    %c0_11 = arith.constant 0 : index
    %12 = vector.load %arg7[%c0_10, %c0_11] : memref<2x256xf32, #tpu.memory_space<vmem>>, vector<2x256xf32>
    tpu.vector_store %arg7[%c0_10, %c0_11], %11 {strides = array<i32>} : memref<2x256xf32, #tpu.memory_space<vmem>>, vector<2x256xf32>,
    %c0_i32_12 = arith.constant 0 : i32
    %13 = arith.cmpi eq, %arg1, %c0_i32_12 : i32
    %14 = arith.extui %13 : i1 to i32
    %c0_i32_13 = arith.constant 0 : i32
    %15 = arith.cmpi ne, %14, %c0_i32_13 : i32
    scf.if %15 {
      %cst = arith.constant 1.000000e+00 : f32
      %16 = vector.broadcast %cst : f32 to vector<1x8x128xf32>
      %c0_14 = arith.constant 0 : index
      %c0_15 = arith.constant 0 : index
      %17 = vector.load %arg6[%c0_14, %c0_15] : memref<2x256xf32, #tpu.memory_space<vmem>>, vector<2x256xf32>
      %18 = vector.shape_cast %17 : vector<2x256xf32> to vector<1x2x256xf32>
      %cst_16 = arith.constant dense<0.000000e+00> : vector<1xf32>
      %19 = vector.multi_reduction <add>, %18, %cst_16 [1, 2] : vector<1x2x256xf32> to vector<1xf32>
      %20 = vector.shape_cast %19 : vector<1xf32> to vector<1x1x1xf32>
      %21 = vector.extract %20[0, 0, 0] : f32 from vector<1x1x1xf32>
      %22 = vector.broadcast %21 : f32 to vector<1x8x128xf32>
      %23 = arith.mulf %22, %16 : vector<1x8x128xf32>
      %c0_17 = arith.constant 0 : index
      %c0_18 = arith.constant 0 : index
      %c0_19 = arith.constant 0 : index
      %24 = vector.load %arg4[%c0_17, %c0_18, %c0_19] : memref<1x8x128xf32, #tpu.memory_space<vmem>>, vector<1x8x128xf32>
      tpu.vector_store %arg4[%c0_17, %c0_18, %c0_19], %23 {strides = array<i32>} : memref<1x8x128xf32, #tpu.memory_space<vmem>>, vector<1x8x128xf32>,
      %c0_20 = arith.constant 0 : index
      %c0_21 = arith.constant 0 : index
      %25 = vector.load %arg7[%c0_20, %c0_21] : memref<2x256xf32, #tpu.memory_space<vmem>>, vector<2x256xf32>
      %26 = vector.shape_cast %25 : vector<2x256xf32> to vector<1x2x256xf32>
      %cst_22 = arith.constant dense<0.000000e+00> : vector<1xf32>
      %27 = vector.multi_reduction <add>, %26, %cst_22 [1, 2] : vector<1x2x256xf32> to vector<1xf32>
      %28 = vector.shape_cast %27 : vector<1xf32> to vector<1x1x1xf32>
      %29 = vector.extract %28[0, 0, 0] : f32 from vector<1x1x1xf32>
      %30 = vector.broadcast %29 : f32 to vector<1x8x128xf32>
      %31 = arith.mulf %30, %16 : vector<1x8x128xf32>
      %c0_23 = arith.constant 0 : index
      %c0_24 = arith.constant 0 : index
      %c0_25 = arith.constant 0 : index
      %32 = vector.load %arg5[%c0_23, %c0_24, %c0_25] : memref<1x8x128xf32, #tpu.memory_space<vmem>>, vector<1x8x128xf32>
      tpu.vector_store %arg5[%c0_23, %c0_24, %c0_25], %31 {strides = array<i32>} : memref<1x8x128xf32, #tpu.memory_space<vmem>>, vector<1x8x128xf32>,
    } else {
    }
    return
  }
  func.func @transform_0(%arg0: i32, %arg1: i32) -> (i32, i32) {
    %c1_i32 = arith.constant 1 : i32
    %0 = arith.muli %arg0, %c1_i32 : i32
    %1 = arith.addi %0, %arg1 : i32
    %c0_i32 = arith.constant 0 : i32
    %2 = arith.minsi %1, %c0_i32 : i32
    %c0_i32_0 = arith.constant 0 : i32
    %c0_i32_1 = arith.constant 0 : i32
    return %c0_i32_0, %2 : i32, i32
  }
  func.func @transform_1(%arg0: i32, %arg1: i32) -> (i32, i32) {
    %c1_i32 = arith.constant 1 : i32
    %0 = arith.muli %arg0, %c1_i32 : i32
    %1 = arith.addi %0, %arg1 : i32
    %c0_i32 = arith.constant 0 : i32
    %2 = arith.minsi %1, %c0_i32 : i32
    %c0_i32_0 = arith.constant 0 : i32
    %c0_i32_1 = arith.constant 0 : i32
    return %c0_i32_0, %2 : i32, i32
  }
  func.func @transform_2(%arg0: i32, %arg1: i32) -> (i32, i32, i32) {
    %c0_i32 = arith.constant 0 : i32
    %c0_i32_0 = arith.constant 0 : i32
    %c0_i32_1 = arith.constant 0 : i32
    return %arg0, %c0_i32, %c0_i32_0 : i32, i32, i32
  }
  func.func @transform_3(%arg0: i32, %arg1: i32) -> (i32, i32, i32) {
    %c0_i32 = arith.constant 0 : i32
    %c0_i32_0 = arith.constant 0 : i32
    %c0_i32_1 = arith.constant 0 : i32
    return %arg0, %c0_i32, %c0_i32_0 : i32, i32, i32
  }
}

</mosaic_0001>

<bundles_post_ra>
// kernel: tpu_custom_call.1
= control target key start
LH: loop header
LB: loop body
LE: loop exit
PB: predicated region body
PF: predicated region fallthrough
CT: control target
= control target key end

     0   :  { %9 = vsyncpa [#allocation5], 0  ;;  %s301_s0 = inlined_call_operand.hbm [shape: f32[2,256], index: 0, kind: input, shape index: {}]   ;;  %s302_s1 = inlined_call_operand.hbm [shape: f32[2,1024], index: 1, kind: input, shape index: {}]   ;;  %s303_s2 = inlined_call_operand.hbm [shape: f32[1,8,128], index: 2, kind: output, shape index: {0}]   ;;  %s304_s3 = inlined_call_operand.hbm [shape: f32[1,8,128], index: 3, kind: output, shape index: {1}]  }
   0x1   :  { %10 = vsyncpa [#allocation8], 0 }
   0x2   :  { %11 = vsyncpa [#allocation6], 0 }
   0x3   :  { %12 = vsyncpa [#allocation11], 0  ;;  %s264_s12 = smov [#allocation4]   ;;  %s265_s14 = smov [#allocation7]  }
   0x4   :  { %s25_s13 = sshll.u32 %s264_s12, 4  ;;  %s41_s15 = sshll.u32 %s265_s14, 4  ;;  %s26_s13 = int_to_ptr.vmem [resolvable:$true] %s25_s13  ;;  %s42_s15 = int_to_ptr.vmem [resolvable:$true] %s41_s15 }
   0x5   :  { %s184_s16 = scalar_lea.vmem %s26_s13, 64  ;;  %p189_p1 = scmp.lt.s32.totalorder %s26_s13, %s26_s13 }
   0x6   :  { %p185_p0 = scmp.ne.s32.totalorder %s26_s13, %s184_s16  ;;  %p190_p2 = scmp.lt.s32.totalorder %s184_s16, %s184_s16 }
   0x8   :  { %p191_p3 = por %p190_p2, %p189_p1 }
   0xa   :  { %p192_p4 = pnand %p191_p3, %p185_p0 }
   0xc   :  { %195 = shalt.err (!%p192_p4)
}
   0xd   :  { %28 = dma.hbm_to_vmem [thread:$0]  %s301_s0, 64, %s26_s13, [#allocation5]  }
   0xe   :  { %s204_s19 = scalar_lea.vmem %s42_s15, 64  ;;  %p209_p6 = scmp.lt.s32.totalorder %s42_s15, %s42_s15 }
   0xf   :  { %p205_p5 = scmp.ne.s32.totalorder %s42_s15, %s204_s19  ;;  %p210_p7 = scmp.lt.s32.totalorder %s204_s19, %s204_s19 }
  0x11   :  { %p211_p8 = por %p210_p7, %p209_p6 }
  0x13   :  { %p212_p9 = pnand %p211_p8, %p205_p5 }
  0x15   :  { %215 = shalt.err (!%p212_p9)
}
  0x16   :  { %44 = dma.hbm_to_vmem [thread:$0]  %s302_s1, 64, %s42_s15, [#allocation8]  }
  0x17   :  { %256 = dma.done.wait [#allocation5], 64  }
  0x18   :  { %257 = vsyncadd [#allocation5], 4294967232 }
  0x19   :  { %258 = dma.done.wait [#allocation8], 64  }
  0x1a   :  { %259 = vsyncadd [#allocation8], 4294967232  ;;  %v266_v0 = vmov 0.0   ;;  %v65_v1 = vld [vmem:[#allocation4] sm:$0xf]  ;;  %vm90_vm0 = vcmask 1041408  }
  0x1b   :  { %63 = vst [vmem:[#allocation2] sm:$0xf] %v266_v0  ;;  %64 = vst [vmem:[#allocation3] sm:$0xf] %v266_v0  ;;  %v66_v2 = vld [vmem:[#allocation7] sm:$0xf] }
  0x1c   :  { %v68_v4 = vmul.f32 %v66_v2, %v65_v1  ;;  %v72_v6 = vadd.f32 %v66_v2, %v65_v1  ;;  %s267_s0 = smov [#allocation9]   ;;  %s268_s23 = smov [#allocation10]  }
  0x1d   :  { %s137_s1 = sshll.u32 %s267_s0, 4  ;;  %s147_s24 = sshll.u32 %s268_s23, 4  ;;  %s138_s1 = int_to_ptr.vmem [resolvable:$true] %s137_s1  ;;  %s148_s24 = int_to_ptr.vmem [resolvable:$true] %s147_s24 }
  0x1e   :  { %s216_s25 = scalar_lea.vmem %s138_s1, 128  ;;  %p221_p11 = scmp.lt.s32.totalorder %s138_s1, %s138_s1 }
  0x1f   :  { %p217_p10 = scmp.ne.s32.totalorder %s138_s1, %s216_s25  ;;  %p222_p12 = scmp.lt.s32.totalorder %s216_s25, %s216_s25 }
  0x21   :  { %p223_p13 = por %p222_p12, %p221_p11 }
  0x22   :  { %v67_v3 = vld [vmem:[#allocation2] sm:$0xf]  ;;  %v71_v5 = vld [vmem:[#allocation3] sm:$0xf] }
  0x23   :  { %v69_v7 = vadd.f32 %v68_v4, %v67_v3  ;;  %v73_v8 = vadd.f32 %v72_v6, %v71_v5  ;;  %p224_p0 = pnand %p223_p13, %p217_p10 }
  0x25   :  { %70 = vst [vmem:[#allocation2] sm:$0xf] %v69_v7  ;;  %74 = vst [vmem:[#allocation3] sm:$0xf] %v73_v8 }
  0x2c   :  { %v165_v9 = vld.sshfl [vmem:[#allocation2] sm:$0x33 pattern:$0x76325410] }
  0x2d   :  { %v87_v10 = vcombine.high %v165_v9, %v165_v9  ;;  %v91_v11 = vsel %vm90_vm0, %v165_v9, 0.0  ;;  %v166_v12 = vld.sshfl [vmem:[#allocation3] sm:$0x33 pattern:$0x76325410] }
  0x2e   :  { %v114_v13 = vcombine.high %v166_v12, %v166_v12  ;;  %v117_v15 = vsel %vm90_vm0, %v166_v12, 0.0 }
  0x2f   :  { %v92_v14 = vsel %vm90_vm0, %v87_v10, 0.0 }
  0x30   :  { %v93_v16 = vadd.f32 %v92_v14, %v91_v11  ;;  %v118_v17 = vsel %vm90_vm0, %v114_v13, 0.0 }
  0x31   :  { %v119_v18 = vadd.f32 %v118_v17, %v117_v15 }
  0x32   :  { %94 = vadd.xlane.f32.xlu0 %v93_v16 }
  0x36   :  { %120 = vadd.xlane.f32.xlu0 %v119_v18 }
  0xbb   :  { %v95_v19 = vpop.xlane.xlu0 %94 }
  0xbc   :  { %v96_v20 = vrot.slane %v95_v19, 4 }
  0xbe   :  { %v97_v21 = vadd.f32 %v96_v20, %v95_v19 }
  0xbf   :  { %v121_v22 = vpop.xlane.xlu0 %120 }
  0xc0   :  { %v98_v23 = vrot.slane %v97_v21, 2  ;;  %v122_v24 = vrot.slane %v121_v22, 4 }
  0xc2   :  { %v123_v25 = vadd.f32 %v122_v24, %v121_v22  ;;  %v99_v26 = vadd.f32 %v98_v23, %v97_v21 }
  0xc4   :  { %v124_v27 = vrot.slane %v123_v25, 2  ;;  %v100_v28 = vrot.slane %v99_v26, 1 }
  0xc6   :  { %v125_v29 = vadd.f32 %v124_v27, %v123_v25  ;;  %v101_v30 = vadd.f32 %v100_v28, %v99_v26 }
  0xc8   :  { %167 = vpush %v101_v30  ;;  %v126_v31 = vrot.slane %v125_v29, 1 }
  0xca   :  { %v127_v32 = vadd.f32 %v126_v31, %v125_v29 }
  0xcc   :  { %169 = vpush %v127_v32 }
  0xf9   :  { %s168_s22 = spop %167 }
  0xfa   :  { %v103_v33 = vstv %s168_s22 }
  0xfb   :  { %104 = vst [vmem:[#allocation9] sm:$0xff] %v103_v33 }
  0xfc   :  { %227 = shalt.err (!%p224_p0)
}
  0xfd   :  { %140 = dma.vmem_to_hbm [thread:$0]  %s138_s1, 128, %s303_s2, [#allocation6]  }
  0xfe   :  { %s170_s28 = spop %169  ;;  %s236_s29 = scalar_lea.vmem %s148_s24, 128 }
  0xff   :  { %v129_v34 = vstv %s170_s28  ;;  %p237_p1 = scmp.ne.s32.totalorder %s148_s24, %s236_s29  ;;  %p241_p2 = scmp.lt.s32.totalorder %s148_s24, %s148_s24 }
 0x100   :  { %130 = vst [vmem:[#allocation10] sm:$0xff] %v129_v34  ;;  %p242_p3 = scmp.lt.s32.totalorder %s236_s29, %s236_s29 }
 0x102   :  { %p243_p4 = por %p242_p3, %p241_p2 }
 0x104   :  { %p244_p5 = pnand %p243_p4, %p237_p1 }
 0x106   :  { %247 = shalt.err (!%p244_p5)
}
 0x107   :  { %150 = dma.vmem_to_hbm [thread:$0]  %s148_s24, 128, %s304_s3, [#allocation11]  }
 0x108   :  { %260 = dma.done.wait [#allocation6], 128  }
 0x109   :  { %261 = vsyncadd [#allocation6], 4294967168 }
 0x10a   :  { %262 = dma.done.wait [#allocation11], 128  }
 0x10b   :  { %263 = vsyncadd [#allocation11], 4294967168 }
 0x10c   :  { %157 = vsyncpa [#allocation5], 1 }
 0x10d   :  { %158 = vsyncpa [#allocation8], 1 }
 0x10e   :  { %159 = vsyncpa [#allocation6], 1 }
 0x10f   :  { %160 = vsyncpa [#allocation11], 1 }

</bundles_post_ra>
